<compile_context>
chip_gen: v6e
topology: v6e:2x2x1
jax: 0.10.0
libtpu: 0.0.40
codegen_flags: <defaults>
</compile_context>

<pallas_src>
import math

import jax
import jax.numpy as jnp
from jax.experimental import pallas as pl
from jax.experimental.pallas import tpu as pltpu

_LANES = 512           # lane-dense last dim (multiple of 128)
_MAX_BLOCK_ROWS = 512  # (512, 512) f32 tile = 1 MiB per buffer

_SIGMA = float(0.1 ** 0.5)   # gaussian: var = 0.1
_SP_AMOUNT = 0.04
_SP_RATIO = 0.5              # salt fraction of flipped pixels


def _normal_field(u):
    """Standard normals, same shape as `u`, via dual-output Box-Muller.

    The lane axis (512 wide) is split at 256 (a clean vreg/lane boundary); the
    left half supplies u1, the right half u2, and both z0 = r*cos(t) and
    z1 = r*sin(t) are used, so log/sqrt/trig work is halved per pixel.
    """
    half = u.shape[-1] // 2
    u1 = jnp.maximum(u[..., :half], jnp.float32(1e-7))   # avoid log(0)
    u2 = u[..., half:]
    r = jnp.sqrt(jnp.float32(-2.0) * jnp.log(u1))
    theta = jnp.float32(2.0 * math.pi) * u2
    return jnp.concatenate([r * jnp.cos(theta), r * jnp.sin(theta)], axis=-1)


def _random_noise_kernel(choice_ref, u_ref, img_ref, out_ref):
    # Clamp so exactly one branch always fires (out_ref must be written on
    # every grid step even if the choice range ever changes).
    choice = jnp.clip(choice_ref[0], 0, 2)

    @pl.when(choice == 0)  # gaussian: image + N(0, 0.1)
    def _():
        img = img_ref[...]
        noise = _normal_field(u_ref[...]) * jnp.float32(_SIGMA)
        out_ref[...] = jnp.clip(img + noise, 0.0, 1.0)

    @pl.when(choice == 1)  # salt & pepper
    def _():
        # TODO(synk): PyTorch flips an *exact* count of pixels via randperm
        # (ceil(0.02*total) salt + ceil(0.02*total) pepper); here one uniform
        # per pixel is thresholded on both tails, matching the 2%/2% rates in
        # expectation (salt and pepper become mutually exclusive per pixel).
        u = u_ref[...]
        img = img_ref[...]
        salt_thr = jnp.float32(1.0 - _SP_AMOUNT * _SP_RATIO)        # 0.98
        pepper_thr = jnp.float32(_SP_AMOUNT * (1.0 - _SP_RATIO))    # 0.02
        y = jnp.where(u >= salt_thr, jnp.float32(1.0), img)
        y = jnp.where(u < pepper_thr, jnp.float32(0.0), y)
        out_ref[...] = jnp.clip(y, 0.0, 1.0)

    @pl.when(choice == 2)  # speckle: image + image * N(0, 1)
    def _():
        img = img_ref[...]
        noise = _normal_field(u_ref[...])
        out_ref[...] = jnp.clip(img + img * noise, 0.0, 1.0)


def random_noise(tensor, key):
    """Pallas equivalent of RandomNoise.forward((image, boxes))."""
    image, boxes = tensor
    orig_shape, orig_dtype = image.shape, image.dtype

    flat = image.astype(jnp.float32).reshape(-1)
    total = flat.shape[0]

    # Lane-dense 2D slab: (rows, 512) with rows a multiple of 8 and of the
    # block row count, so the grid divides evenly and tiles are vreg-aligned.
    rows = pl.cdiv(total, _LANES)
    rows = pl.cdiv(rows, 8) * 8
    block_rows = min(_MAX_BLOCK_ROWS, rows)
    rows = pl.cdiv(rows, block_rows) * block_rows
    padded = rows * _LANES

    k_choice, k_u = jax.random.split(key)
    choice = jax.random.randint(k_choice, (1,), 0, 3, dtype=jnp.int32)
    # TODO(synk): the on-chip PRNG (pltpu.prng_seed / prng_random_bits) has no
    # CPU/interpret lowering, so uniforms are generated with jax.random and
    # streamed into the kernel; every tile automatically sees distinct noise.
    uniforms = jax.random.uniform(k_u, (rows, _LANES), dtype=jnp.float32)

    img2d = jnp.pad(flat, (0, padded - total)).reshape(rows, _LANES)

    tile = pl.BlockSpec((block_rows, _LANES), lambda i: (i, 0))
    out2d = pl.pallas_call(
        _random_noise_kernel,
        out_shape=jax.ShapeDtypeStruct((rows, _LANES), jnp.float32),
        grid=(rows // block_rows,),
        in_specs=[
            pl.BlockSpec(memory_space=pltpu.MemorySpace.SMEM),  # choice scalar
            tile,                                               # uniform field
            tile,                                               # image slab
        ],
        out_specs=tile,
        compiler_params=pltpu.CompilerParams(
            dimension_semantics=("parallel",),
        ),
    )(choice, uniforms, img2d)

    out_image = out2d.reshape(-1)[:total].reshape(orig_shape).astype(orig_dtype)

    # Bounding boxes pass through unchanged, exactly as in the PyTorch module.
    return out_image, boxes


if __name__ == "__main__":
    key = jax.random.PRNGKey(0)
    k_img, k_boxes, k_noise = jax.random.split(key, 3)

    # Small, module-consistent shapes: single CHW image + (N, 4) boxes.
    image = jax.random.uniform(k_img, (4, 16, 16), dtype=jnp.float32)
    boxes = jax.random.uniform(k_boxes, (3, 4), dtype=jnp.float32) * 16.0

    out_image, out_boxes = random_noise((image, boxes), k_noise)
    jax.block_until_ready((out_image, out_boxes))

    assert out_image.shape == image.shape and out_image.dtype == image.dtype
    assert bool(jnp.all(out_image >= 0.0)) and bool(jnp.all(out_image <= 1.0))
    assert bool(jnp.all(out_boxes == boxes))
    print("KERNEL_OK")
</pallas_src>

<mosaic_0001>
module attributes {stable_mosaic.version = 11 : i64} {
  func.func @_random_noise_kernel(%arg0: i32, %arg1: memref<1xi32, #tpu.memory_space<smem>>, %arg2: memref<8x512xf32, #tpu.memory_space<vmem>>, %arg3: memref<8x512xf32, #tpu.memory_space<vmem>>, %arg4: memref<8x512xf32, #tpu.memory_space<vmem>>) attributes {dimension_semantics = [#tpu.dimension_semantics<parallel>], iteration_bounds = array<i64: 1>, scalar_prefetch = 0 : i64, scratch_operands = 0 : i64, tpu.core_type = #tpu.core_type<tc>, window_params = [{transform_indices = @transform_0, window_bounds = array<i64: 1>}, {transform_indices = @transform_1, window_bounds = array<i64: 8, 512>}, {transform_indices = @transform_2, window_bounds = array<i64: 8, 512>}, {transform_indices = @transform_3, window_bounds = array<i64: 8, 512>}]} {
    %c0 = arith.constant 0 : index
    %0 = memref.load %arg1[%c0] : memref<1xi32, #tpu.memory_space<smem>>
    %c0_i32 = arith.constant 0 : i32
    %c2_i32 = arith.constant 2 : i32
    %1 = arith.maxsi %c0_i32, %0 : i32
    %2 = arith.minsi %c2_i32, %1 : i32
    %c0_i32_0 = arith.constant 0 : i32
    %3 = arith.cmpi eq, %2, %c0_i32_0 : i32
    %4 = arith.extui %3 : i1 to i32
    %c0_i32_1 = arith.constant 0 : i32
    %5 = arith.cmpi ne, %4, %c0_i32_1 : i32
    scf.if %5 {
      %c0_5 = arith.constant 0 : index
      %c0_6 = arith.constant 0 : index
      %12 = vector.load %arg3[%c0_5, %c0_6] : memref<8x512xf32, #tpu.memory_space<vmem>>, vector<8x512xf32>
      %c0_7 = arith.constant 0 : index
      %c0_8 = arith.constant 0 : index
      %13 = vector.load %arg2[%c0_7, %c0_8] : memref<8x512xf32, #tpu.memory_space<vmem>>, vector<8x512xf32>
      %14 = vector.extract_strided_slice %13 {offsets = [0, 0], sizes = [8, 256], strides = [1, 1]} : vector<8x512xf32> to vector<8x256xf32>
      %cst = arith.constant 1.000000e-07 : f32
      %15 = vector.broadcast %cst : f32 to vector<8x256xf32>
      %16 = arith.maximumf %14, %15 : vector<8x256xf32>
      %17 = vector.extract_strided_slice %13 {offsets = [0, 256], sizes = [8, 256], strides = [1, 1]} : vector<8x512xf32> to vector<8x256xf32>
      %18 = math.log %16 : vector<8x256xf32>
      %cst_9 = arith.constant -2.000000e+00 : f32
      %19 = vector.broadcast %cst_9 : f32 to vector<8x256xf32>
      %20 = arith.mulf %19, %18 : vector<8x256xf32>
      %21 = math.sqrt %20 : vector<8x256xf32>
      %cst_10 = arith.constant 6.28318548 : f32
      %22 = vector.broadcast %cst_10 : f32 to vector<8x256xf32>
      %23 = arith.mulf %22, %17 : vector<8x256xf32>
      %24 = math.cos %23 : vector<8x256xf32>
      %25 = arith.mulf %21, %24 : vector<8x256xf32>
      %26 = math.sin %23 : vector<8x256xf32>
      %27 = arith.mulf %21, %26 : vector<8x256xf32>
      %28 = tpu.concatenate %25, %27 in 1 : vector<8x256xf32>, vector<8x256xf32> -> vector<8x512xf32>
      %cst_11 = arith.constant 0.316227764 : f32
      %29 = vector.broadcast %cst_11 : f32 to vector<8x512xf32>
      %30 = arith.mulf %28, %29 : vector<8x512xf32>
      %31 = arith.addf %12, %30 : vector<8x512xf32>
      %cst_12 = arith.constant 0.000000e+00 : f32
      %cst_13 = arith.constant 1.000000e+00 : f32
      %32 = vector.broadcast %cst_12 : f32 to vector<8x512xf32>
      %33 = arith.maximumf %32, %31 : vector<8x512xf32>
      %34 = vector.broadcast %cst_13 : f32 to vector<8x512xf32>
      %35 = arith.minimumf %34, %33 : vector<8x512xf32>
      %c0_14 = arith.constant 0 : index
      %c0_15 = arith.constant 0 : index
      %36 = vector.load %arg4[%c0_14, %c0_15] : memref<8x512xf32, #tpu.memory_space<vmem>>, vector<8x512xf32>
      tpu.vector_store %arg4[%c0_14, %c0_15], %35 {strides = array<i32>} : memref<8x512xf32, #tpu.memory_space<vmem>>, vector<8x512xf32>,
    } else {
    }
    %c1_i32 = arith.constant 1 : i32
    %6 = arith.cmpi eq, %2, %c1_i32 : i32
    %7 = arith.extui %6 : i1 to i32
    %c0_i32_2 = arith.constant 0 : i32
    %8 = arith.cmpi ne, %7, %c0_i32_2 : i32
    scf.if %8 {
      %c0_5 = arith.constant 0 : index
      %c0_6 = arith.constant 0 : index
      %12 = vector.load %arg2[%c0_5, %c0_6] : memref<8x512xf32, #tpu.memory_space<vmem>>, vector<8x512xf32>
      %c0_7 = arith.constant 0 : index
      %c0_8 = arith.constant 0 : index
      %13 = vector.load %arg3[%c0_7, %c0_8] : memref<8x512xf32, #tpu.memory_space<vmem>>, vector<8x512xf32>
      %cst = arith.constant 9.800000e-01 : f32
      %14 = vector.broadcast %cst : f32 to vector<8x512xf32>
      %15 = arith.cmpf oge, %12, %14 : vector<8x512xf32>
      %cst_9 = arith.constant 1.000000e+00 : f32
      %16 = vector.broadcast %cst_9 : f32 to vector<8x512xf32>
      %17 = arith.select %15, %16, %13 : vector<8x512xi1>, vector<8x512xf32>
      %cst_10 = arith.constant 2.000000e-02 : f32
      %18 = vector.broadcast %cst_10 : f32 to vector<8x512xf32>
      %19 = arith.cmpf olt, %12, %18 : vector<8x512xf32>
      %cst_11 = arith.constant 0.000000e+00 : f32
      %20 = vector.broadcast %cst_11 : f32 to vector<8x512xf32>
      %21 = arith.select %19, %20, %17 : vector<8x512xi1>, vector<8x512xf32>
      %cst_12 = arith.constant 0.000000e+00 : f32
      %cst_13 = arith.constant 1.000000e+00 : f32
      %22 = vector.broadcast %cst_12 : f32 to vector<8x512xf32>
      %23 = arith.maximumf %22, %21 : vector<8x512xf32>
      %24 = vector.broadcast %cst_13 : f32 to vector<8x512xf32>
      %25 = arith.minimumf %24, %23 : vector<8x512xf32>
      %c0_14 = arith.constant 0 : index
      %c0_15 = arith.constant 0 : index
      %26 = vector.load %arg4[%c0_14, %c0_15] : memref<8x512xf32, #tpu.memory_space<vmem>>, vector<8x512xf32>
      tpu.vector_store %arg4[%c0_14, %c0_15], %25 {strides = array<i32>} : memref<8x512xf32, #tpu.memory_space<vmem>>, vector<8x512xf32>,
    } else {
    }
    %c2_i32_3 = arith.constant 2 : i32
    %9 = arith.cmpi eq, %2, %c2_i32_3 : i32
    %10 = arith.extui %9 : i1 to i32
    %c0_i32_4 = arith.constant 0 : i32
    %11 = arith.cmpi ne, %10, %c0_i32_4 : i32
    scf.if %11 {
      %c0_5 = arith.constant 0 : index
      %c0_6 = arith.constant 0 : index
      %12 = vector.load %arg3[%c0_5, %c0_6] : memref<8x512xf32, #tpu.memory_space<vmem>>, vector<8x512xf32>
      %c0_7 = arith.constant 0 : index
      %c0_8 = arith.constant 0 : index
      %13 = vector.load %arg2[%c0_7, %c0_8] : memref<8x512xf32, #tpu.memory_space<vmem>>, vector<8x512xf32>
      %14 = vector.extract_strided_slice %13 {offsets = [0, 0], sizes = [8, 256], strides = [1, 1]} : vector<8x512xf32> to vector<8x256xf32>
      %cst = arith.constant 1.000000e-07 : f32
      %15 = vector.broadcast %cst : f32 to vector<8x256xf32>
      %16 = arith.maximumf %14, %15 : vector<8x256xf32>
      %17 = vector.extract_strided_slice %13 {offsets = [0, 256], sizes = [8, 256], strides = [1, 1]} : vector<8x512xf32> to vector<8x256xf32>
      %18 = math.log %16 : vector<8x256xf32>
      %cst_9 = arith.constant -2.000000e+00 : f32
      %19 = vector.broadcast %cst_9 : f32 to vector<8x256xf32>
      %20 = arith.mulf %19, %18 : vector<8x256xf32>
      %21 = math.sqrt %20 : vector<8x256xf32>
      %cst_10 = arith.constant 6.28318548 : f32
      %22 = vector.broadcast %cst_10 : f32 to vector<8x256xf32>
      %23 = arith.mulf %22, %17 : vector<8x256xf32>
      %24 = math.cos %23 : vector<8x256xf32>
      %25 = arith.mulf %21, %24 : vector<8x256xf32>
      %26 = math.sin %23 : vector<8x256xf32>
      %27 = arith.mulf %21, %26 : vector<8x256xf32>
      %28 = tpu.concatenate %25, %27 in 1 : vector<8x256xf32>, vector<8x256xf32> -> vector<8x512xf32>
      %29 = arith.mulf %12, %28 : vector<8x512xf32>
      %30 = arith.addf %12, %29 : vector<8x512xf32>
      %cst_11 = arith.constant 0.000000e+00 : f32
      %cst_12 = arith.constant 1.000000e+00 : f32
      %31 = vector.broadcast %cst_11 : f32 to vector<8x512xf32>
      %32 = arith.maximumf %31, %30 : vector<8x512xf32>
      %33 = vector.broadcast %cst_12 : f32 to vector<8x512xf32>
      %34 = arith.minimumf %33, %32 : vector<8x512xf32>
      %c0_13 = arith.constant 0 : index
      %c0_14 = arith.constant 0 : index
      %35 = vector.load %arg4[%c0_13, %c0_14] : memref<8x512xf32, #tpu.memory_space<vmem>>, vector<8x512xf32>
      tpu.vector_store %arg4[%c0_13, %c0_14], %34 {strides = array<i32>} : memref<8x512xf32, #tpu.memory_space<vmem>>, vector<8x512xf32>,
    } else {
    }
    return
  }
  func.func @transform_0(%arg0: i32) -> i32 {
    %c0_i32 = arith.constant 0 : i32
    %c0_i32_0 = arith.constant 0 : i32
    return %c0_i32 : i32
  }
  func.func @transform_1(%arg0: i32) -> (i32, i32) {
    %c0_i32 = arith.constant 0 : i32
    %c0_i32_0 = arith.constant 0 : i32
    return %arg0, %c0_i32 : i32, i32
  }
  func.func @transform_2(%arg0: i32) -> (i32, i32) {
    %c0_i32 = arith.constant 0 : i32
    %c0_i32_0 = arith.constant 0 : i32
    return %arg0, %c0_i32 : i32, i32
  }
  func.func @transform_3(%arg0: i32) -> (i32, i32) {
    %c0_i32 = arith.constant 0 : i32
    %c0_i32_0 = arith.constant 0 : i32
    return %arg0, %c0_i32 : i32, i32
  }
}

</mosaic_0001>

<bundles_post_ra>
// kernel: tpu_custom_call.1
= control target key start
LH: loop header
LB: loop body
LE: loop exit
PB: predicated region body
PF: predicated region fallthrough
CT: control target
= control target key end

     0   :  { %9 = vsyncpa [#allocation4], 0  ;;  %s1488_s0 = inlined_call_operand.<no memory space> [shape: s32[1], index: 0, kind: input, shape index: {}]   ;;  %s1489_s1 = inlined_call_operand.hbm [shape: f32[8,512], index: 1, kind: input, shape index: {}]   ;;  %s1490_s2 = inlined_call_operand.hbm [shape: f32[8,512], index: 2, kind: input, shape index: {}]   ;;  %s1491_s3 = inlined_call_operand.hbm [shape: f32[8,512], index: 3, kind: output, shape index: {}]  }
   0x1   :  { %10 = vsyncpa [#allocation7], 0 }
   0x2   :  { %11 = vsyncpa [#allocation5], 0  ;;  %s1220_s12 = smov [#allocation3]   ;;  %s1221_s14 = smov [#allocation6]  }
   0x3   :  { %s20_s13 = sshll.u32 %s1220_s12, 4  ;;  %s30_s15 = sshll.u32 %s1221_s14, 4  ;;  %s21_s13 = int_to_ptr.vmem [resolvable:$true] %s20_s13  ;;  %s31_s15 = int_to_ptr.vmem [resolvable:$true] %s30_s15 }
   0x4   :  { %s1162_s16 = scalar_lea.vmem %s21_s13, 512  ;;  %p1167_p1 = scmp.lt.s32.totalorder %s21_s13, %s21_s13 }
   0x5   :  { %p1163_p0 = scmp.ne.s32.totalorder %s21_s13, %s1162_s16  ;;  %p1168_p2 = scmp.lt.s32.totalorder %s1162_s16, %s1162_s16 }
   0x7   :  { %p1169_p3 = por %p1168_p2, %p1167_p1 }
   0x9   :  { %p1170_p4 = pnand %p1169_p3, %p1163_p0 }
   0xb   :  { %1173 = shalt.err (!%p1170_p4)
}
   0xc   :  { %23 = dma.hbm_to_vmem [thread:$0]  %s1489_s1, 512, %s21_s13, [#allocation4]  }
   0xd   :  { %s1182_s19 = scalar_lea.vmem %s31_s15, 512  ;;  %p1187_p6 = scmp.lt.s32.totalorder %s31_s15, %s31_s15 }
   0xe   :  { %p1183_p5 = scmp.ne.s32.totalorder %s31_s15, %s1182_s19  ;;  %p1188_p7 = scmp.lt.s32.totalorder %s1182_s19, %s1182_s19 }
  0x10   :  { %p1189_p8 = por %p1188_p7, %p1187_p6 }
  0x12   :  { %p1190_p9 = pnand %p1189_p8, %p1183_p5 }
  0x14   :  { %1193 = shalt.err (!%p1190_p9)
}
  0x15   :  { %33 = dma.hbm_to_vmem [thread:$0]  %s1490_s2, 512, %s31_s15, [#allocation7]  }
  0x16   :  { %1214 = dma.done.wait [#allocation4], 512  }
  0x17   :  { %1215 = vsyncadd [#allocation4], 4294966784 }
  0x18   :  { %1216 = dma.done.wait [#allocation7], 512  }
  0x19   :  { %1217 = vsyncadd [#allocation7], 4294966784  ;;  %p41_p10 = scmp.gt.s32.totalorder %s1488_s0, 0  ;;  %p1049_p11 = scmp.lt.s32.totalorder %s1488_s0, 2 }
  0x1b   :  { %s1501_s0 = smov (!%p41_p10, %s1488_s0), 0 }
  0x1c   :  { %s1503_s0 = smov (!%p1049_p11, %s1501_s0), 2 }
  0x1d   :  { %p1054_p12 = scmp.ne.s32.totalorder %s1503_s0, 0 }
  0x1f   :  { %48 = sbr.rel (%p1054_p12) target bundleno = 143 (0x8f), region = 25 }
  0x24   :  { %v55_v0 = vld [vmem:[#allocation3 + $0x10] sm:$0xff]  ;;  %v56_v1 = vld [vmem:[#allocation3 + $0x18] sm:$0xff]  ;;  %v1222_v17 = vmov 683565275   ;;  %v1223_v19 = vmov 2475754826  }
  0x25   :  { %v1273_v2 = vmul.f32 6.2831855, %v55_v0  ;;  %v1275_v3 = vmul.f32 6.2831855, %v56_v1  ;;  %v1224_v26 = vmov 2131351028  }
  0x26   :  { %v1225_v29 = vmov 2102212464   ;;  %v1226_v32 = vmov 920167782   ;;  %v1227_v35 = vmov 1326507024  }
  0x27   :  { %v84_v4 = vand.u32 2139095040, %v1273_v2  ;;  %v187_v5 = vand.u32 2139095040, %v1275_v3  ;;  %v81_v9 = vand.u32 2147483647, %v1273_v2  ;;  %v184_v23 = vand.u32 2147483647, %v1275_v3 }
  0x28   :  { %vm83_vm13 = vcmp.lt.s32.totalorder %v1273_v2, 0 }
  0x29   :  { %v85_v6 = vshrl.u32 %v84_v4, 23  ;;  %v188_v7 = vshrl.u32 %v187_v5, 23  ;;  %v88_v13 = vand.u32 8388607, %v81_v9  ;;  %v191_v42 = vand.u32 8388607, %v184_v23 }
  0x2a   :  { %vm1334_vm15 = vcmp.le.f32.partialorder %v81_v9, 0.7853982 }
  0x2b   :  { %v1055_v8 = vadd.s32 4294967169, %v85_v6  ;;  %v1059_v10 = vadd.s32 4294967169, %v188_v7  ;;  %v89_v21 = vor.u32 8388608, %v88_v13 }
  0x2d   :  { %v91_v11 = vadd.s32 1, %v1055_v8  ;;  %v194_v12 = vadd.s32 1, %v1059_v10  ;;  %v129_v41 = vshll.u32 %v89_v21, 8 }
  0x2f   :  { %vm92_vm0 = vcmp.gt.s32.totalorder %v91_v11, 0  ;;  %vm195_vm1 = vcmp.gt.s32.totalorder %v194_v12, 0 }
  0x30   :  { %v93_v14 = vsel %vm92_vm0, %v91_v11, 0  ;;  %v196_v24 = vsel %vm195_vm1, %v194_v12, 0  ;;  %vm1349_vm0 = vcmp.le.f32.partialorder %v184_v23, 0.7853982  ;;  %vm186_vm1 = vcmp.lt.s32.totalorder %v1275_v3, 0 }
  0x31   :  { %v95_v15 = vand.u32 31, %v93_v14  ;;  %v94_v22 = vshrl.u32 %v93_v14, 5  ;;  %v198_v40 = vand.u32 31, %v196_v24  ;;  %v197_v56 = vshrl.u32 %v196_v24, 5 }
  0x33   :  { %v96_v16 = vsub.s32 32, %v95_v15  ;;  %v98_v18 = vshll.u32 %v1222_v17, %v95_v15  ;;  %v101_v20 = vshll.u32 %v1223_v19, %v95_v15  ;;  %v104_v28 = vshll.u32 %v1224_v26, %v95_v15 }
  0x34   :  { %v107_v30 = vshll.u32 %v1225_v29, %v95_v15  ;;  %v110_v34 = vshll.u32 %v1226_v32, %v95_v15  ;;  %vm113_vm2 = vcmp.lt.s32.totalorder %v94_v22, 1  ;;  %vm114_vm3 = vcmp.lt.s32.totalorder %v94_v22, 2 }
  0x35   :  { %v99_v25 = vshrl.u32 %v1223_v19, %v96_v16  ;;  %v102_v27 = vshrl.u32 %v1224_v26, %v96_v16  ;;  %v105_v31 = vshrl.u32 %v1225_v29, %v96_v16  ;;  %v108_v33 = vshrl.u32 %v1226_v32, %v96_v16 }
  0x36   :  { %v111_v36 = vshrl.u32 %v1227_v35, %v96_v16  ;;  %v97_v37 = vshrl.u32 %v1222_v17, %v96_v16  ;;  %vm115_vm4 = vcmp.lt.s32.totalorder %v94_v22, 3  ;;  %vm116_vm5 = vcmp.lt.s32.totalorder %v94_v22, 4 }
  0x37   :  { %v100_v38 = vor.u32 %v99_v25, %v98_v18  ;;  %v103_v39 = vor.u32 %v102_v27, %v101_v20  ;;  %v106_v43 = vor.u32 %v105_v31, %v104_v28  ;;  %v109_v44 = vor.u32 %v108_v33, %v107_v30  ;;  %v53_v20 = vld [vmem:[#allocation3] sm:$0xff] }
  0x38   :  { %v112_v45 = vor.u32 %v111_v36, %v110_v34  ;;  %v199_v48 = vsub.s32 32, %v198_v40  ;;  %v201_v60 = vshll.u32 %v1222_v17, %v198_v40  ;;  %v204_v5 = vshll.u32 %v1223_v19, %v198_v40 }
  0x39   :  { %v117_v46 = vsel %vm113_vm2, %v97_v37, %v100_v38  ;;  %v121_v47 = vsel %vm113_vm2, %v100_v38, %v103_v39  ;;  %v118_v49 = vsel %vm116_vm5, %v106_v43, 2102212464  ;;  %v122_v50 = vsel %vm116_vm5, %v109_v44, 920167782 }
  0x3a   :  { %v125_v51 = vsel %vm113_vm2, %v103_v39, %v106_v43  ;;  %v126_v52 = vsel %vm116_vm5, %v112_v45, 1326507024  ;;  %v119_v53 = vsel %vm115_vm4, %v103_v39, %v118_v49  ;;  %v123_v54 = vsel %vm115_vm4, %v106_v43, %v122_v50  ;;  %v54_v50 = vld [vmem:[#allocation3 + $0x8] sm:$0xff] }
  0x3b   :  { %v127_v55 = vsel %vm115_vm4, %v109_v44, %v126_v52  ;;  %v120_v57 = vsel %vm114_vm3, %v117_v46, %v119_v53  ;;  %v124_v58 = vsel %vm114_vm3, %v121_v47, %v123_v54  ;;  %v202_v4 = vshrl.u32 %v1223_v19, %v199_v48 }
  0x3c   :  { %v128_v59 = vsel %vm114_vm3, %v125_v51, %v127_v55  ;;  %v1294_v63 = vmul.u32.u64.low %v129_v41, %v124_v58  ;;  %v1295_v0 = vmul.u32.u64.high %v129_v41, %v124_v58, %v1294_v63  ;;  %v136_v1 = vmul.u32 %v129_v41, %v120_v57 }
  0x3d   :  { %v1291_v61 = vmul.u32.u64.low %v129_v41, %v128_v59  ;;  %v1292_v62 = vmul.u32.u64.high %v129_v41, %v128_v59, %v1291_v61  ;;  %v205_v6 = vshrl.u32 %v1224_v26, %v199_v48  ;;  %v207_v7 = vshll.u32 %v1224_v26, %v198_v40 }
  0x3e   :  { %v208_v8 = vshrl.u32 %v1225_v29, %v199_v48  ;;  %v210_v10 = vshll.u32 %v1225_v29, %v198_v40  ;;  %v211_v11 = vshrl.u32 %v1226_v32, %v199_v48  ;;  %v203_v12 = vor.u32 %v202_v4, %v201_v60 }
  0x3f   :  { %v206_v13 = vor.u32 %v205_v6, %v204_v5  ;;  %v213_v14 = vshll.u32 %v1226_v32, %v198_v40  ;;  %v214_v15 = vshrl.u32 %v1227_v35, %v199_v48  ;;  %vm138_vm6 = vc.u32 %v1292_v62, %v1294_v63 }
  0x40   :  { %v139_v16 = vadd.s32 1, %v1295_v0  ;;  %v192_v18 = vor.u32 8388608, %v191_v42  ;;  %v200_v21 = vshrl.u32 %v1222_v17, %v199_v48  ;;  %v209_v22 = vor.u32 %v208_v8, %v207_v7 }
  0x41   :  { %v212_v19 = vor.u32 %v211_v11, %v210_v10  ;;  %vm216_vm7 = vcmp.lt.s32.totalorder %v197_v56, 1  ;;  %v215_v25 = vor.u32 %v214_v15, %v213_v14  ;;  %vm218_vm8 = vcmp.lt.s32.totalorder %v197_v56, 3 }
  0x42   :  { %v140_v24 = vsel %vm138_vm6, %v139_v16, %v1295_v0  ;;  %vm219_vm9 = vcmp.lt.s32.totalorder %v197_v56, 4  ;;  %vm217_vm10 = vcmp.lt.s32.totalorder %v197_v56, 2  ;;  %v224_v28 = vsel %vm216_vm7, %v203_v12, %v206_v13 }
  0x43   :  { %v141_v26 = vadd.s32 %v140_v24, %v136_v1  ;;  %v221_v27 = vsel %vm219_vm9, %v209_v22, 2102212464  ;;  %v57_v29 = vmax.f32 %v53_v20, 1e-07  ;;  %v225_v30 = vsel %vm219_vm9, %v212_v19, 920167782 }
  0x44   :  { %v232_v31 = vshll.u32 %v192_v18, 8  ;;  %v226_v33 = vsel %vm218_vm8, %v209_v22, %v225_v30  ;;  %v228_v34 = vsel %vm216_vm7, %v206_v13, %v209_v22  ;;  %v220_v17 = vsel %vm216_vm7, %v200_v21, %v203_v12 }
  0x45   :  { %v142_v32 = vadd.s32 536870912, %v141_v26  ;;  %v222_v35 = vsel %vm218_vm8, %v206_v13, %v221_v27  ;;  %v227_v36 = vsel %vm217_vm10, %v224_v28, %v226_v33  ;;  %v229_v37 = vsel %vm219_vm9, %v215_v25, 1326507024 }
  0x46   :  { %v230_v39 = vsel %vm218_vm8, %v212_v19, %v229_v37  ;;  %1122 = vlog2.f32 %v57_v29  ;;  %v1310_v41 = vmul.u32.u64.low %v232_v31, %v227_v36  ;;  %v1311_v42 = vmul.u32.u64.high %v232_v31, %v227_v36, %v1310_v41 }
  0x47   :  { %v1306_v38 = vshrl.u32 %v142_v32, 30  ;;  %v231_v40 = vsel %vm217_vm10, %v228_v34, %v230_v39  ;;  %v223_v44 = vsel %vm217_vm10, %v220_v17, %v222_v35  ;;  %v58_v54 = vmax.f32 %v54_v50, 1e-07 }
  0x48   :  { %v1315_v45 = vmul.u32.u64.low %v232_v31, %v231_v40  ;;  %v1316_v46 = vmul.u32.u64.high %v232_v31, %v231_v40, %v1315_v45  ;;  %v239_v48 = vmul.u32 %v232_v31, %v223_v44  ;;  %v242_v49 = vadd.s32 1, %v1311_v42 }
  0x49   :  { %v144_v43 = vshll.u32 %v1306_v38, 30  ;;  %1124 = vlog2.f32 %v58_v54  ;;  %v137_v61 = vadd.s32 %v1294_v63, %v1292_v62  ;;  %v167_v24 = vsub.s32 4, %v1306_v38 }
  0x4a   :  { %vm241_vm11 = vc.u32 %v1316_v46, %v1310_v41  ;;  %v240_v25 = vadd.s32 %v1310_v41, %v1316_v46  ;;  %vm173_vm10 = vweird.f32 %v1273_v2 }
  0x4b   :  { %v145_v47 = vsub.s32 %v141_v26, %v144_v43  ;;  %v243_v52 = vsel %vm241_vm11, %v242_v49, %v1311_v42  ;;  %v168_v34 = vsel %vm83_vm13, %v167_v24, %v1306_v38 }
  0x4c   :  { %v244_v55 = vadd.s32 %v243_v52, %v239_v48  ;;  %v170_v40 = vsel %vm1334_vm15, 0, %v168_v34 }
  0x4d   :  { %v147_v51 = vsub.s32 0, %v145_v47  ;;  %v382_v43 = vadd.s32 3, %v170_v40  ;;  %v174_v49 = vand.u32 3, %v170_v40 }
  0x4e   :  { %v245_v58 = vadd.s32 536870912, %v244_v55 }
  0x4f   :  { %v1056_v53 = vmin.u32 %v147_v51, %v145_v47  ;;  %v383_v51 = vand.u32 3, %v382_v43  ;;  %vm179_vm4 = vcmp.eq.s32.totalorder %v174_v49, 2  ;;  %vm176_vm6 = vcmp.eq.s32.totalorder %v174_v49, 0  ;;  %v50_v43 = vld [vmem:[#allocation6 + $0x8] sm:$0xff] }
  0x50   :  { %v1321_v59 = vshrl.u32 %v245_v58, 30  ;;  %vm175_vm8 = vcmp.lt.s32.totalorder %v174_v49, 2 }
  0x51   :  { %v149_v57 = vclz %v1056_v53  ;;  %vm388_vm5 = vcmp.eq.s32.totalorder %v383_v51, 2  ;;  %vm385_vm7 = vcmp.eq.s32.totalorder %v383_v51, 0  ;;  %vm384_vm9 = vcmp.lt.s32.totalorder %v383_v51, 2 }
  0x52   :  { %v247_v1 = vshll.u32 %v1321_v59, 30 }
  0x53   :  { %v1057_v56 = vadd.s32 4294967294, %v149_v57  ;;  %v1123_v60 = vpop.eup %1122 }
  0x54   :  { %v60_v7 = vmul.f32 0.6931472, %v1123_v60  ;;  %v248_v8 = vsub.s32 %v244_v55, %v247_v1 }
  0x55   :  { %vm1058_vm12 = vcmp.lt.s32.totalorder %v1057_v56, 0 }
  0x56   :  { %v152_v0 = vsel %vm1058_vm12, 0, %v1057_v56  ;;  %v250_v12 = vsub.s32 0, %v248_v8  ;;  %v1326_v15 = vmul.f32 -2.0, %v60_v7  ;;  %v1125_v22 = vpop.eup %1124 }
  0x57   :  { %v153_v4 = vsub.s32 32, %v152_v0  ;;  %v154_v5 = vshll.u32 %v145_v47, %v152_v0  ;;  %v157_v6 = vsub.s32 4294967266, %v152_v0  ;;  %v62_v29 = vmul.f32 0.6931472, %v1125_v22 }
  0x58   :  { %v1060_v16 = vmin.u32 %v250_v12, %v248_v8  ;;  %1126 = vrsqrt.f32 %v1326_v15  ;;  %v270_v47 = vsub.s32 4, %v1321_v59  ;;  %vm67_vm2 = vcmp.eq.f32.partialorder %v1326_v15, inf }
  0x59   :  { %v155_v10 = vshrl.u32 %v137_v61, %v153_v4  ;;  %v158_v11 = vadd.s32 127, %v157_v6  ;;  %v1342_v9 = vmul.f32 -2.0, %v62_v29  ;;  %vm69_vm3 = vcmp.eq.f32.partialorder %v1326_v15, 0.0 }
  0x5a   :  { %v252_v62 = vclz %v1060_v16  ;;  %v70_v53 = vand.u32 2147483648, %v1326_v15  ;;  %v271_v23 = vsel %vm186_vm1, %v270_v47, %v1321_v59  ;;  %v49_v16 = vld [vmem:[#allocation6] sm:$0xff] }
  0x5b   :  { %v156_v13 = vor.u32 %v155_v10, %v154_v5  ;;  %v159_v14 = vshll.u32 %v158_v11, 23  ;;  %v273_v59 = vsel %vm1349_vm0, 0, %v271_v23  ;;  %vm74_vm11 = vcmp.eq.f32.partialorder %v1342_v9, inf }
  0x5c   :  { %v1061_v21 = vadd.s32 4294967294, %v252_v62  ;;  %v486_v10 = vadd.s32 3, %v273_v59  ;;  %vm76_vm12 = vcmp.eq.f32.partialorder %v1342_v9, 0.0  ;;  %v77_v24 = vand.u32 2147483648, %v1342_v9 }
  0x5d   :  { %v160_v18 = vor.u32 4788187, %v159_v14  ;;  %v163_v20 = vcvt.s32.f32 %v156_v13 }
  0x5e   :  { %vm1062_vm14 = vcmp.lt.s32.totalorder %v1061_v21, 0  ;;  %v487_v62 = vand.u32 3, %v486_v10 }
  0x5f   :  { %v161_v63 = vand.u32 2147483647, %v160_v18  ;;  %v255_v28 = vsel %vm1062_vm14, 0, %v1061_v21  ;;  %v51_v18 = vld [vmem:[#allocation6 + $0x10] sm:$0xff] }
  0x60   :  { %v256_v30 = vsub.s32 32, %v255_v28  ;;  %v257_v31 = vshll.u32 %v248_v8, %v255_v28  ;;  %v260_v32 = vsub.s32 4294967266, %v255_v28  ;;  %vm492_vm14 = vcmp.eq.s32.totalorder %v487_v62, 2 }
  0x61   :  { %v164_v19 = vmul.f32 %v163_v20, %v161_v63 }
  0x62   :  { %v258_v35 = vshrl.u32 %v240_v25, %v256_v30  ;;  %v261_v36 = vadd.s32 127, %v260_v32 }
  0x63   :  { %v165_v27 = vxor.u32 2147483648, %v164_v19 }
  0x64   :  { %v259_v37 = vor.u32 %v258_v35, %v257_v31  ;;  %v262_v39 = vshll.u32 %v261_v36, 23 }
  0x65   :  { %v166_v33 = vsel %vm83_vm13, %v165_v27, %v164_v19  ;;  %v1127_v44 = vpop.eup %1126 }
  0x66   :  { %v169_v17 = vsel %vm1334_vm15, %v1273_v2, %v166_v33  ;;  %v263_v41 = vor.u32 4788187, %v262_v39  ;;  %v266_v42 = vcvt.s32.f32 %v259_v37  ;;  %v66_v48 = vmul.f32 %v1127_v44, %v1326_v15  ;;  %v52_v44 = vld [vmem:[#allocation6 + $0x18] sm:$0xff] }
  0x67   :  { %1128 = vcosq.f32 %v169_v17  ;;  %v277_v2 = vand.u32 3, %v273_v59 }
  0x68   :  { %1130 = vsinq.f32 %v169_v17  ;;  %v264_v38 = vand.u32 2147483647, %v263_v41  ;;  %v68_v57 = vsel %vm67_vm2, %v1326_v15, %v66_v48  ;;  %vm488_vm2 = vcmp.lt.s32.totalorder %v487_v62, 2 }
  0x69   :  { %1132 = vrsqrt.f32 %v1342_v9  ;;  %v71_v1 = vsel %vm69_vm3, %v70_v53, %v68_v57  ;;  %vm282_vm13 = vcmp.eq.s32.totalorder %v277_v2, 2  ;;  %vm278_vm15 = vcmp.lt.s32.totalorder %v277_v2, 2 }
  0x6a   :  { %v267_v45 = vmul.f32 %v266_v42, %v264_v38  ;;  %vm276_vm3 = vweird.f32 %v1275_v3 }
  0x6c   :  { %v268_v50 = vxor.u32 2147483648, %v267_v45 }
  0x6e   :  { %v269_v52 = vsel %vm186_vm1, %v268_v50, %v267_v45  ;;  %vm489_vm1 = vcmp.eq.s32.totalorder %v487_v62, 0 }
  0x6f   :  { %v272_v54 = vsel %vm1349_vm0, %v1275_v3, %v269_v52  ;;  %vm279_vm0 = vcmp.eq.s32.totalorder %v277_v2, 0 }
  0x70   :  { %1134 = vcosq.f32 %v272_v54 }
  0x71   :  { %1136 = vsinq.f32 %v272_v54 }
  0x74   :  { %v1129_v55 = vpop.eup %1128 }
  0x75   :  { %v1131_v58 = vpop.eup %1130  ;;  %v180_v56 = vxor.u32 2147483648, %v1129_v55 }
  0x76   :  { %v177_v60 = vxor.u32 2147483648, %v1131_v58  ;;  %v1133_v6 = vpop.eup %1132 }
  0x77   :  { %v181_v61 = vsel %vm179_vm4, %v180_v56, %v1131_v58  ;;  %v390_v0 = vsel %vm388_vm5, %v180_v56, %v1131_v58  ;;  %v73_v20 = vmul.f32 %v1133_v6, %v1342_v9 }
  0x78   :  { %v178_v4 = vsel %vm176_vm6, %v1129_v55, %v177_v60  ;;  %v387_v5 = vsel %vm385_vm7, %v1129_v55, %v177_v60 }
  0x79   :  { %v182_v7 = vsel %vm175_vm8, %v178_v4, %v181_v61  ;;  %v391_v8 = vsel %vm384_vm9, %v387_v5, %v390_v0  ;;  %v75_v19 = vsel %vm74_vm11, %v1342_v9, %v73_v20 }
  0x7a   :  { %v183_v11 = vsel %vm173_vm10, nan, %v182_v7  ;;  %v392_v12 = vsel %vm173_vm10, nan, %v391_v8  ;;  %v78_v17 = vsel %vm76_vm12, %v77_v24, %v75_v19 }
  0x7b   :  { %v287_v13 = vmul.f32 %v183_v11, %v71_v1  ;;  %v497_v14 = vmul.f32 %v392_v12, %v71_v1 }
  0x7d   :  { %v499_v15 = vmul.f32 0.31622776, %v287_v13  ;;  %v501_v63 = vmul.f32 0.31622776, %v497_v14  ;;  %v1135_v25 = vpop.eup %1134 }
  0x7e   :  { %v1137_v28 = vpop.eup %1136  ;;  %v283_v29 = vxor.u32 2147483648, %v1135_v25 }
  0x7f   :  { %v503_v21 = vadd.f32 %v499_v15, %v49_v16  ;;  %v505_v22 = vadd.f32 %v501_v63, %v51_v18  ;;  %v280_v30 = vxor.u32 2147483648, %v1137_v28 }
  0x80   :  { %v284_v33 = vsel %vm282_vm13, %v283_v29, %v1137_v28  ;;  %v494_v34 = vsel %vm492_vm14, %v283_v29, %v1137_v28 }
  0x81   :  { %v507_v26 = vmax.f32 %v503_v21, 0.0  ;;  %v509_v27 = vmax.f32 %v505_v22, 0.0  ;;  %v281_v35 = vsel %vm279_vm0, %v1135_v25, %v280_v30  ;;  %v491_v36 = vsel %vm489_vm1, %v1135_v25, %v280_v30 }
  0x82   :  { %v285_v37 = vsel %vm278_vm15, %v281_v35, %v284_v33  ;;  %v495_v39 = vsel %vm488_vm2, %v491_v36, %v494_v34 }
  0x83   :  { %v511_v31 = vmin.f32 %v507_v26, 1.0  ;;  %v513_v32 = vmin.f32 %v509_v27, 1.0  ;;  %v286_v40 = vsel %vm276_vm3, nan, %v285_v37  ;;  %v496_v41 = vsel %vm276_vm3, nan, %v495_v39 }
  0x84   :  { %v288_v42 = vmul.f32 %v286_v40, %v78_v17  ;;  %v498_v38 = vmul.f32 %v496_v41, %v78_v17 }
  0x85   :  { %515 = vst [vmem:[#allocation8] sm:$0xff] %v511_v31  ;;  %517 = vst [vmem:[#allocation8 + $0x10] sm:$0xff] %v513_v32 }
  0x86   :  { %v500_v45 = vmul.f32 0.31622776, %v288_v42  ;;  %v502_v3 = vmul.f32 0.31622776, %v498_v38 }
  0x88   :  { %v504_v46 = vadd.f32 %v500_v45, %v50_v43  ;;  %v506_v47 = vadd.f32 %v502_v3, %v52_v44 }
  0x8a   :  { %v508_v48 = vmax.f32 %v504_v46, 0.0  ;;  %v510_v9 = vmax.f32 %v506_v47, 0.0 }
  0x8c   :  { %v512_v49 = vmin.f32 %v508_v48, 1.0  ;;  %v514_v50 = vmin.f32 %v510_v9, 1.0 }
  0x8e   :  { %516 = vst [vmem:[#allocation8 + $0x8] sm:$0xff] %v512_v49  ;;  %518 = vst [vmem:[#allocation8 + $0x18] sm:$0xff] %v514_v50 }
  0x8f PF:  { %p1071_p13 = scmp.ne.s32.totalorder %s1503_s0, 1 }
  0x91   :  { %522 = sbr.rel (%p1071_p13) target bundleno = 163 (0xa3), region = 29 }
  0x96   :  { %v523_v51 = vld [vmem:[#allocation3] sm:$0xff]  ;;  %v524_v53 = vld [vmem:[#allocation3 + $0x8] sm:$0xff]  ;;  %v525_v54 = vld [vmem:[#allocation3 + $0x10] sm:$0xff] }
  0x97   :  { %v527_v52 = vld [vmem:[#allocation6] sm:$0xff]  ;;  %vm531_vm4 = vcmp.ge.f32.partialorder %v523_v51, 0.98  ;;  %vm539_vm5 = vcmp.lt.f32.partialorder %v523_v51, 0.02  ;;  %v528_v23 = vld [vmem:[#allocation6 + $0x8] sm:$0xff] }
  0x98   :  { %v535_v55 = vsel %vm531_vm4, 1.0, %v527_v52  ;;  %vm532_vm6 = vcmp.ge.f32.partialorder %v524_v53, 0.98  ;;  %vm540_vm7 = vcmp.lt.f32.partialorder %v524_v53, 0.02  ;;  %v529_v57 = vld [vmem:[#allocation6 + $0x10] sm:$0xff] }
  0x99   :  { %v543_v58 = vsel %vm539_vm5, 0.0, %v535_v55  ;;  %v536_v56 = vsel %vm532_vm6, 1.0, %v528_v23  ;;  %vm533_vm8 = vcmp.ge.f32.partialorder %v525_v54, 0.98  ;;  %vm541_vm9 = vcmp.lt.f32.partialorder %v525_v54, 0.02 }
  0x9a   :  { %v547_v60 = vmax.f32 %v543_v58, 0.0  ;;  %v544_v59 = vsel %vm540_vm7, 0.0, %v536_v56  ;;  %v537_v61 = vsel %vm533_vm8, 1.0, %v529_v57  ;;  %v526_v0 = vld [vmem:[#allocation3 + $0x18] sm:$0xff] }
  0x9b   :  { %v530_v1 = vld [vmem:[#allocation6 + $0x18] sm:$0xff]  ;;  %v548_v4 = vmax.f32 %v544_v59, 0.0  ;;  %v545_v5 = vsel %vm541_vm9, 0.0, %v537_v61  ;;  %vm534_vm10 = vcmp.ge.f32.partialorder %v526_v0, 0.98 }
  0x9c   :  { %vm542_vm11 = vcmp.lt.f32.partialorder %v526_v0, 0.02  ;;  %v551_v6 = vmin.f32 %v547_v60, 1.0  ;;  %v549_v7 = vmax.f32 %v545_v5, 0.0  ;;  %v538_v8 = vsel %vm534_vm10, 1.0, %v530_v1 }
  0x9d   :  { %v552_v10 = vmin.f32 %v548_v4, 1.0  ;;  %v546_v11 = vsel %vm542_vm11, 0.0, %v538_v8 }
  0x9e   :  { %555 = vst [vmem:[#allocation8] sm:$0xff] %v551_v6  ;;  %v553_v12 = vmin.f32 %v549_v7, 1.0  ;;  %v550_v13 = vmax.f32 %v546_v11, 0.0 }
  0x9f   :  { %556 = vst [vmem:[#allocation8 + $0x8] sm:$0xff] %v552_v10 }
  0xa0   :  { %557 = vst [vmem:[#allocation8 + $0x10] sm:$0xff] %v553_v12  ;;  %v554_v14 = vmin.f32 %v550_v13, 1.0 }
  0xa2   :  { %558 = vst [vmem:[#allocation8 + $0x18] sm:$0xff] %v554_v14 }
  0xa3 PF:  { %p1072_p0 = scmp.ne.s32.totalorder %s1503_s0, 2 }
  0xa5   :  { %562 = sbr.rel (%p1072_p0) target bundleno = 277 (0x115), region = 33 }
  0xaa   :  { %v569_v16 = vld [vmem:[#allocation3 + $0x10] sm:$0xff]  ;;  %v570_v18 = vld [vmem:[#allocation3 + $0x18] sm:$0xff]  ;;  %v1228_v31 = vmov 683565275   ;;  %v1229_v33 = vmov 2475754826  }
  0xab   :  { %v1380_v20 = vmul.f32 6.2831855, %v569_v16  ;;  %v1382_v2 = vmul.f32 6.2831855, %v570_v18  ;;  %v1230_v40 = vmov 2131351028  }
  0xac   :  { %v1231_v38 = vmov 2102212464   ;;  %v1232_v45 = vmov 920167782   ;;  %v1233_v47 = vmov 1326507024  }
  0xad   :  { %v598_v62 = vand.u32 2139095040, %v1380_v20  ;;  %v701_v15 = vand.u32 2139095040, %v1382_v2  ;;  %v595_v19 = vand.u32 2147483647, %v1380_v20  ;;  %v698_v36 = vand.u32 2147483647, %v1382_v2 }
  0xae   :  { %vm597_vm9 = vcmp.lt.s32.totalorder %v1380_v20, 0 }
  0xaf   :  { %v599_v63 = vshrl.u32 %v598_v62, 23  ;;  %v702_v21 = vshrl.u32 %v701_v15, 23  ;;  %v602_v27 = vand.u32 8388607, %v595_v19  ;;  %v705_v53 = vand.u32 8388607, %v698_v36 }
  0xb0   :  { %vm1441_vm11 = vcmp.le.f32.partialorder %v595_v19, 0.7853982 }
  0xb1   :  { %v1073_v22 = vadd.s32 4294967169, %v599_v63  ;;  %v1077_v24 = vadd.s32 4294967169, %v702_v21  ;;  %v603_v17 = vor.u32 8388608, %v602_v27 }
  0xb3   :  { %v605_v25 = vadd.s32 1, %v1073_v22  ;;  %v708_v26 = vadd.s32 1, %v1077_v24  ;;  %v643_v52 = vshll.u32 %v603_v17, 8 }
  0xb5   :  { %vm606_vm12 = vcmp.gt.s32.totalorder %v605_v25, 0  ;;  %vm709_vm13 = vcmp.gt.s32.totalorder %v708_v26, 0 }
  0xb6   :  { %v607_v28 = vsel %vm606_vm12, %v605_v25, 0  ;;  %v710_v37 = vsel %vm709_vm13, %v708_v26, 0  ;;  %vm1456_vm12 = vcmp.le.f32.partialorder %v698_v36, 0.7853982  ;;  %vm700_vm13 = vcmp.lt.s32.totalorder %v1382_v2, 0 }
  0xb7   :  { %v609_v29 = vand.u32 31, %v607_v28  ;;  %v608_v35 = vshrl.u32 %v607_v28, 5  ;;  %v712_v51 = vand.u32 31, %v710_v37  ;;  %v711_v6 = vshrl.u32 %v710_v37, 5 }
  0xb9   :  { %v610_v30 = vsub.s32 32, %v609_v29  ;;  %v612_v32 = vshll.u32 %v1228_v31, %v609_v29  ;;  %v615_v34 = vshll.u32 %v1229_v33, %v609_v29  ;;  %v618_v42 = vshll.u32 %v1230_v40, %v609_v29 }
  0xba   :  { %v621_v43 = vshll.u32 %v1231_v38, %v609_v29  ;;  %v624_v46 = vshll.u32 %v1232_v45, %v609_v29  ;;  %vm627_vm14 = vcmp.lt.s32.totalorder %v608_v35, 1  ;;  %vm628_vm15 = vcmp.lt.s32.totalorder %v608_v35, 2 }
  0xbb   :  { %v613_v39 = vshrl.u32 %v1229_v33, %v610_v30  ;;  %v616_v41 = vshrl.u32 %v1230_v40, %v610_v30  ;;  %v619_v44 = vshrl.u32 %v1231_v38, %v610_v30  ;;  %v622_v3 = vshrl.u32 %v1232_v45, %v610_v30 }
  0xbc   :  { %v625_v48 = vshrl.u32 %v1233_v47, %v610_v30  ;;  %v611_v9 = vshrl.u32 %v1228_v31, %v610_v30  ;;  %vm629_vm0 = vcmp.lt.s32.totalorder %v608_v35, 3  ;;  %vm630_vm1 = vcmp.lt.s32.totalorder %v608_v35, 4 }
  0xbd   :  { %v614_v49 = vor.u32 %v613_v39, %v612_v32  ;;  %v617_v50 = vor.u32 %v616_v41, %v615_v34  ;;  %v620_v23 = vor.u32 %v619_v44, %v618_v42  ;;  %v623_v54 = vor.u32 %v622_v3, %v621_v43  ;;  %v567_v34 = vld [vmem:[#allocation3] sm:$0xff] }
  0xbe   :  { %v626_v55 = vor.u32 %v625_v48, %v624_v46  ;;  %v713_v56 = vsub.s32 32, %v712_v51  ;;  %v715_v11 = vshll.u32 %v1228_v31, %v712_v51  ;;  %v718_v15 = vshll.u32 %v1229_v33, %v712_v51 }
  0xbf   :  { %v631_v57 = vsel %vm627_vm14, %v611_v9, %v614_v49  ;;  %v635_v58 = vsel %vm627_vm14, %v614_v49, %v617_v50  ;;  %v632_v60 = vsel %vm630_vm1, %v620_v23, 2102212464  ;;  %v636_v59 = vsel %vm630_vm1, %v623_v54, 920167782 }
  0xc0   :  { %v639_v61 = vsel %vm627_vm14, %v617_v50, %v620_v23  ;;  %v640_v0 = vsel %vm630_vm1, %v626_v55, 1326507024  ;;  %v633_v1 = vsel %vm629_vm0, %v617_v50, %v632_v60  ;;  %v637_v4 = vsel %vm629_vm0, %v620_v23, %v636_v59  ;;  %v568_v59 = vld [vmem:[#allocation3 + $0x8] sm:$0xff] }
  0xc1   :  { %v641_v5 = vsel %vm629_vm0, %v623_v54, %v640_v0  ;;  %v634_v7 = vsel %vm628_vm15, %v631_v57, %v633_v1  ;;  %v638_v8 = vsel %vm628_vm15, %v635_v58, %v637_v4  ;;  %v716_v62 = vshrl.u32 %v1229_v33, %v713_v56 }
  0xc2   :  { %v642_v10 = vsel %vm628_vm15, %v639_v61, %v641_v5  ;;  %v1401_v14 = vmul.u32.u64.low %v643_v52, %v638_v8  ;;  %v1402_v16 = vmul.u32.u64.high %v643_v52, %v638_v8, %v1401_v14  ;;  %v650_v18 = vmul.u32 %v643_v52, %v634_v7 }
  0xc3   :  { %v1398_v12 = vmul.u32.u64.low %v643_v52, %v642_v10  ;;  %v1399_v13 = vmul.u32.u64.high %v643_v52, %v642_v10, %v1398_v12  ;;  %v719_v63 = vshrl.u32 %v1230_v40, %v713_v56  ;;  %v721_v21 = vshll.u32 %v1230_v40, %v712_v51 }
  0xc4   :  { %v722_v22 = vshrl.u32 %v1231_v38, %v713_v56  ;;  %v724_v24 = vshll.u32 %v1231_v38, %v712_v51  ;;  %v725_v25 = vshrl.u32 %v1232_v45, %v713_v56  ;;  %v717_v26 = vor.u32 %v716_v62, %v715_v11 }
  0xc5   :  { %v720_v27 = vor.u32 %v719_v63, %v718_v15  ;;  %v727_v28 = vshll.u32 %v1232_v45, %v712_v51  ;;  %v728_v29 = vshrl.u32 %v1233_v47, %v713_v56  ;;  %vm652_vm2 = vc.u32 %v1399_v13, %v1401_v14 }
  0xc6   :  { %v653_v30 = vadd.s32 1, %v1402_v16  ;;  %v706_v32 = vor.u32 8388608, %v705_v53  ;;  %v714_v17 = vshrl.u32 %v1228_v31, %v713_v56  ;;  %v723_v35 = vor.u32 %v722_v22, %v721_v21 }
  0xc7   :  { %v726_v33 = vor.u32 %v725_v25, %v724_v24  ;;  %vm730_vm3 = vcmp.lt.s32.totalorder %v711_v6, 1  ;;  %v729_v39 = vor.u32 %v728_v29, %v727_v28  ;;  %vm732_vm4 = vcmp.lt.s32.totalorder %v711_v6, 3 }
  0xc8   :  { %v654_v37 = vsel %vm652_vm2, %v653_v30, %v1402_v16  ;;  %vm733_vm5 = vcmp.lt.s32.totalorder %v711_v6, 4  ;;  %vm731_vm6 = vcmp.lt.s32.totalorder %v711_v6, 2  ;;  %v738_v42 = vsel %vm730_vm3, %v717_v26, %v720_v27 }
  0xc9   :  { %v655_v40 = vadd.s32 %v654_v37, %v650_v18  ;;  %v735_v41 = vsel %vm733_vm5, %v723_v35, 2102212464  ;;  %v571_v38 = vmax.f32 %v567_v34, 1e-07  ;;  %v739_v43 = vsel %vm733_vm5, %v726_v33, 920167782 }
  0xca   :  { %v746_v44 = vshll.u32 %v706_v32, 8  ;;  %v740_v3 = vsel %vm732_vm4, %v723_v35, %v739_v43  ;;  %v742_v46 = vsel %vm730_vm3, %v720_v27, %v723_v35  ;;  %v734_v31 = vsel %vm730_vm3, %v714_v17, %v717_v26 }
  0xcb   :  { %v656_v45 = vadd.s32 536870912, %v655_v40  ;;  %v736_v47 = vsel %vm732_vm4, %v720_v27, %v735_v41  ;;  %v741_v48 = vsel %vm731_vm6, %v738_v42, %v740_v3  ;;  %v743_v9 = vsel %vm733_vm5, %v729_v39, 1326507024 }
  0xcc   :  { %v744_v50 = vsel %vm732_vm4, %v726_v33, %v743_v9  ;;  %1138 = vlog2.f32 %v571_v38  ;;  %v1417_v52 = vmul.u32.u64.low %v746_v44, %v741_v48  ;;  %v1418_v53 = vmul.u32.u64.high %v746_v44, %v741_v48, %v1417_v52 }
  0xcd   :  { %v1413_v49 = vshrl.u32 %v656_v45, 30  ;;  %v745_v51 = vsel %vm731_vm6, %v742_v46, %v744_v50  ;;  %v737_v54 = vsel %vm731_vm6, %v734_v31, %v736_v47  ;;  %v572_v4 = vmax.f32 %v568_v59, 1e-07 }
  0xce   :  { %v1422_v55 = vmul.u32.u64.low %v746_v44, %v745_v51  ;;  %v1423_v57 = vmul.u32.u64.high %v746_v44, %v745_v51, %v1422_v55  ;;  %v753_v56 = vmul.u32 %v746_v44, %v737_v54  ;;  %v756_v60 = vadd.s32 1, %v1418_v53 }
  0xcf   :  { %v658_v23 = vshll.u32 %v1413_v49, 30  ;;  %1140 = vlog2.f32 %v572_v4  ;;  %v651_v12 = vadd.s32 %v1401_v14, %v1399_v13  ;;  %v681_v37 = vsub.s32 4, %v1413_v49 }
  0xd0   :  { %vm755_vm7 = vc.u32 %v1423_v57, %v1417_v52  ;;  %v754_v39 = vadd.s32 %v1417_v52, %v1423_v57  ;;  %vm687_vm6 = vweird.f32 %v1380_v20 }
  0xd1   :  { %v659_v58 = vsub.s32 %v655_v40, %v658_v23  ;;  %v757_v0 = vsel %vm755_vm7, %v756_v60, %v1418_v53  ;;  %v682_v46 = vsel %vm597_vm9, %v681_v37, %v1413_v49 }
  0xd2   :  { %v758_v5 = vadd.s32 %v757_v0, %v753_v56  ;;  %v684_v51 = vsel %vm1441_vm11, 0, %v682_v46 }
  0xd3   :  { %v661_v61 = vsub.s32 0, %v659_v58  ;;  %v896_v23 = vadd.s32 3, %v684_v51  ;;  %v688_v60 = vand.u32 3, %v684_v51  ;;  %v564_v51 = vld [vmem:[#allocation6 + $0x8] sm:$0xff] }
  0xd4   :  { %v759_v8 = vadd.s32 536870912, %v758_v5 }
  0xd5   :  { %v1074_v1 = vmin.u32 %v661_v61, %v659_v58  ;;  %v897_v61 = vand.u32 3, %v896_v23  ;;  %vm693_vm0 = vcmp.eq.s32.totalorder %v688_v60, 2  ;;  %vm690_vm2 = vcmp.eq.s32.totalorder %v688_v60, 0 }
  0xd6   :  { %v1428_v10 = vshrl.u32 %v759_v8, 30  ;;  %vm689_vm4 = vcmp.lt.s32.totalorder %v688_v60, 2 }
  0xd7   :  { %v663_v7 = vclz %v1074_v1  ;;  %vm902_vm1 = vcmp.eq.s32.totalorder %v897_v61, 2  ;;  %vm899_vm3 = vcmp.eq.s32.totalorder %v897_v61, 0  ;;  %vm898_vm5 = vcmp.lt.s32.totalorder %v897_v61, 2 }
  0xd8   :  { %v761_v18 = vshll.u32 %v1428_v10, 30 }
  0xd9   :  { %v1075_v6 = vadd.s32 4294967294, %v663_v7  ;;  %v1139_v11 = vpop.eup %1138 }
  0xda   :  { %v574_v21 = vmul.f32 0.6931472, %v1139_v11  ;;  %v762_v22 = vsub.s32 %v758_v5, %v761_v18 }
  0xdb   :  { %vm1076_vm8 = vcmp.lt.s32.totalorder %v1075_v6, 0 }
  0xdc   :  { %v666_v16 = vsel %vm1076_vm8, 0, %v1075_v6  ;;  %v764_v26 = vsub.s32 0, %v762_v22  ;;  %v1433_v29 = vmul.f32 -2.0, %v574_v21  ;;  %v1141_v35 = vpop.eup %1140 }
  0xdd   :  { %v667_v62 = vsub.s32 32, %v666_v16  ;;  %v668_v15 = vshll.u32 %v659_v58, %v666_v16  ;;  %v671_v63 = vsub.s32 4294967266, %v666_v16  ;;  %v576_v38 = vmul.f32 0.6931472, %v1141_v35 }
  0xde   :  { %v1078_v30 = vmin.u32 %v764_v26, %v762_v22  ;;  %1142 = vrsqrt.f32 %v1433_v29  ;;  %v784_v58 = vsub.s32 4, %v1428_v10  ;;  %vm581_vm14 = vcmp.eq.f32.partialorder %v1433_v29, inf  ;;  %v565_v26 = vld [vmem:[#allocation6 + $0x10] sm:$0xff] }
  0xdf   :  { %v669_v24 = vshrl.u32 %v651_v12, %v667_v62  ;;  %v672_v25 = vadd.s32 127, %v671_v63  ;;  %v1449_v19 = vmul.f32 -2.0, %v576_v38  ;;  %vm583_vm15 = vcmp.eq.f32.partialorder %v1433_v29, 0.0 }
  0xe0   :  { %v766_v13 = vclz %v1078_v30  ;;  %v584_v1 = vand.u32 2147483648, %v1433_v29  ;;  %v785_v36 = vsel %vm700_vm13, %v784_v58, %v1428_v10 }
  0xe1   :  { %v670_v27 = vor.u32 %v669_v24, %v668_v15  ;;  %v673_v28 = vshll.u32 %v672_v25, 23  ;;  %v787_v10 = vsel %vm1456_vm12, 0, %v785_v36  ;;  %v563_v25 = vld [vmem:[#allocation6] sm:$0xff]  ;;  %vm588_vm7 = vcmp.eq.f32.partialorder %v1449_v19, inf }
  0xe2   :  { %v1079_v17 = vadd.s32 4294967294, %v766_v13  ;;  %v1000_v24 = vadd.s32 3, %v787_v10  ;;  %vm590_vm8 = vcmp.eq.f32.partialorder %v1449_v19, 0.0  ;;  %v591_v37 = vand.u32 2147483648, %v1449_v19 }
  0xe3   :  { %v674_v32 = vor.u32 4788187, %v673_v28  ;;  %v677_v34 = vcvt.s32.f32 %v670_v27 }
  0xe4   :  { %vm1080_vm10 = vcmp.lt.s32.totalorder %v1079_v17, 0  ;;  %v1001_v13 = vand.u32 3, %v1000_v24 }
  0xe5   :  { %v675_v14 = vand.u32 2147483647, %v674_v32  ;;  %v769_v42 = vsel %vm1080_vm10, 0, %v1079_v17 }
  0xe6   :  { %v770_v43 = vsub.s32 32, %v769_v42  ;;  %v771_v44 = vshll.u32 %v762_v22, %v769_v42  ;;  %v774_v45 = vsub.s32 4294967266, %v769_v42  ;;  %vm1006_vm10 = vcmp.eq.s32.totalorder %v1001_v13, 2 }
  0xe7   :  { %v678_v33 = vmul.f32 %v677_v34, %v675_v14 }
  0xe8   :  { %v772_v47 = vshrl.u32 %v754_v39, %v770_v43  ;;  %v775_v48 = vadd.s32 127, %v774_v45 }
  0xe9   :  { %v679_v41 = vxor.u32 2147483648, %v678_v33 }
  0xea   :  { %v773_v9 = vor.u32 %v772_v47, %v771_v44  ;;  %v776_v50 = vshll.u32 %v775_v48, 23 }
  0xeb   :  { %v680_v3 = vsel %vm597_vm9, %v679_v41, %v678_v33  ;;  %v1143_v54 = vpop.eup %1142 }
  0xec   :  { %v683_v31 = vsel %vm1441_vm11, %v1380_v20, %v680_v3  ;;  %v777_v52 = vor.u32 4788187, %v776_v50  ;;  %v780_v53 = vcvt.s32.f32 %v773_v9  ;;  %v580_v56 = vmul.f32 %v1143_v54, %v1433_v29 }
  0xed   :  { %1144 = vcosq.f32 %v683_v31  ;;  %v791_v20 = vand.u32 3, %v787_v10 }
  0xee   :  { %1146 = vsinq.f32 %v683_v31  ;;  %v778_v49 = vand.u32 2147483647, %v777_v52  ;;  %v582_v7 = vsel %vm581_vm14, %v1433_v29, %v580_v56  ;;  %vm1002_vm14 = vcmp.lt.s32.totalorder %v1001_v13, 2  ;;  %v566_v52 = vld [vmem:[#allocation6 + $0x18] sm:$0xff] }
  0xef   :  { %1148 = vrsqrt.f32 %v1449_v19  ;;  %v585_v18 = vsel %vm583_vm15, %v584_v1, %v582_v7  ;;  %vm796_vm9 = vcmp.eq.s32.totalorder %v791_v20, 2  ;;  %vm792_vm11 = vcmp.lt.s32.totalorder %v791_v20, 2 }
  0xf0   :  { %v781_v55 = vmul.f32 %v780_v53, %v778_v49  ;;  %vm790_vm15 = vweird.f32 %v1382_v2 }
  0xf2   :  { %v782_v59 = vxor.u32 2147483648, %v781_v55 }
  0xf4   :  { %v783_v0 = vsel %vm700_vm13, %v782_v59, %v781_v55  ;;  %vm1003_vm13 = vcmp.eq.s32.totalorder %v1001_v13, 0 }
  0xf5   :  { %v786_v4 = vsel %vm1456_vm12, %v1382_v2, %v783_v0  ;;  %vm793_vm12 = vcmp.eq.s32.totalorder %v791_v20, 0 }
  0xf6   :  { %1150 = vcosq.f32 %v786_v4 }
  0xf7   :  { %1152 = vsinq.f32 %v786_v4 }
  0xfa   :  { %v1145_v5 = vpop.eup %1144 }
  0xfb   :  { %v1147_v8 = vpop.eup %1146  ;;  %v694_v6 = vxor.u32 2147483648, %v1145_v5 }
  0xfc   :  { %v691_v11 = vxor.u32 2147483648, %v1147_v8  ;;  %v1149_v63 = vpop.eup %1148 }
  0xfd   :  { %v695_v12 = vsel %vm693_vm0, %v694_v6, %v1147_v8  ;;  %v904_v16 = vsel %vm902_vm1, %v694_v6, %v1147_v8  ;;  %v587_v34 = vmul.f32 %v1149_v63, %v1449_v19 }
  0xfe   :  { %v692_v62 = vsel %vm690_vm2, %v1145_v5, %v691_v11  ;;  %v901_v15 = vsel %vm899_vm3, %v1145_v5, %v691_v11 }
  0xff   :  { %v696_v21 = vsel %vm689_vm4, %v692_v62, %v695_v12  ;;  %v905_v22 = vsel %vm898_vm5, %v901_v15, %v904_v16  ;;  %v589_v33 = vsel %vm588_vm7, %v1449_v19, %v587_v34 }
 0x100   :  { %v697_v27 = vsel %vm687_vm6, nan, %v696_v21  ;;  %v906_v28 = vsel %vm687_vm6, nan, %v905_v22  ;;  %v592_v31 = vsel %vm590_vm8, %v591_v37, %v589_v33 }
 0x101   :  { %v801_v30 = vmul.f32 %v697_v27, %v585_v18  ;;  %v1011_v32 = vmul.f32 %v906_v28, %v585_v18 }
 0x103   :  { %v1013_v29 = vmul.f32 %v801_v30, %v563_v25  ;;  %v1015_v14 = vmul.f32 %v1011_v32, %v565_v26  ;;  %v1151_v39 = vpop.eup %1150 }
 0x104   :  { %v1153_v42 = vpop.eup %1152  ;;  %v797_v38 = vxor.u32 2147483648, %v1151_v39 }
 0x105   :  { %v1017_v17 = vadd.f32 %v1013_v29, %v563_v25  ;;  %v1019_v35 = vadd.f32 %v1015_v14, %v565_v26  ;;  %v794_v43 = vxor.u32 2147483648, %v1153_v42 }
 0x106   :  { %v798_v3 = vsel %vm796_vm9, %v797_v38, %v1153_v42  ;;  %v1008_v46 = vsel %vm1006_vm10, %v797_v38, %v1153_v42 }
 0x107   :  { %v1021_v40 = vmax.f32 %v1017_v17, 0.0  ;;  %v1023_v41 = vmax.f32 %v1019_v35, 0.0  ;;  %v795_v47 = vsel %vm793_vm12, %v1151_v39, %v794_v43  ;;  %v1005_v48 = vsel %vm1003_vm13, %v1151_v39, %v794_v43 }
 0x108   :  { %v799_v9 = vsel %vm792_vm11, %v795_v47, %v798_v3  ;;  %v1009_v50 = vsel %vm1002_vm14, %v1005_v48, %v1008_v46 }
 0x109   :  { %v1025_v44 = vmin.f32 %v1021_v40, 1.0  ;;  %v1027_v45 = vmin.f32 %v1023_v41, 1.0  ;;  %v800_v53 = vsel %vm790_vm15, nan, %v799_v9  ;;  %v1010_v49 = vsel %vm790_vm15, nan, %v1009_v50 }
 0x10a   :  { %v802_v23 = vmul.f32 %v800_v53, %v592_v31  ;;  %v1012_v54 = vmul.f32 %v1010_v49, %v592_v31 }
 0x10b   :  { %1029 = vst [vmem:[#allocation8] sm:$0xff] %v1025_v44  ;;  %1031 = vst [vmem:[#allocation8 + $0x10] sm:$0xff] %v1027_v45 }
 0x10c   :  { %v1014_v55 = vmul.f32 %v802_v23, %v564_v51  ;;  %v1016_v2 = vmul.f32 %v1012_v54, %v566_v52 }
 0x10e   :  { %v1018_v57 = vadd.f32 %v1014_v55, %v564_v51  ;;  %v1020_v58 = vadd.f32 %v1016_v2, %v566_v52 }
 0x110   :  { %v1022_v56 = vmax.f32 %v1018_v57, 0.0  ;;  %v1024_v19 = vmax.f32 %v1020_v58, 0.0 }
 0x112   :  { %v1026_v60 = vmin.f32 %v1022_v56, 1.0  ;;  %v1028_v59 = vmin.f32 %v1024_v19, 1.0 }
 0x114   :  { %1030 = vst [vmem:[#allocation8 + $0x8] sm:$0xff] %v1026_v60  ;;  %1032 = vst [vmem:[#allocation8 + $0x18] sm:$0xff] %v1028_v59 }
 0x115 PF:  { %s1234_s0 = smov [#allocation8]  }
 0x116   :  { %s1039_s2 = sshll.u32 %s1234_s0, 4  ;;  %s1040_s2 = int_to_ptr.vmem [resolvable:$true] %s1039_s2 }
 0x117   :  { %s1194_s27 = scalar_lea.vmem %s1040_s2, 512  ;;  %p1199_p2 = scmp.lt.s32.totalorder %s1040_s2, %s1040_s2 }
 0x118   :  { %p1195_p1 = scmp.ne.s32.totalorder %s1040_s2, %s1194_s27  ;;  %p1200_p3 = scmp.lt.s32.totalorder %s1194_s27, %s1194_s27 }
 0x11a   :  { %p1201_p4 = por %p1200_p3, %p1199_p2 }
 0x11c   :  { %p1202_p5 = pnand %p1201_p4, %p1195_p1 }
 0x11e   :  { %1205 = shalt.err (!%p1202_p5)
}
 0x11f   :  { %1042 = dma.vmem_to_hbm [thread:$0]  %s1040_s2, 512, %s1491_s3, [#allocation5]  }
 0x120   :  { %1218 = dma.done.wait [#allocation5], 512  }
 0x121   :  { %1219 = vsyncadd [#allocation5], 4294966784 }
 0x122   :  { %1046 = vsyncpa [#allocation4], 1 }
 0x123   :  { %1047 = vsyncpa [#allocation7], 1 }
 0x124   :  { %1048 = vsyncpa [#allocation5], 1 }

</bundles_post_ra>
